<compile_context>
chip_gen: v7x
topology: tpu7x:2x2x1
jax: 0.10.0
libtpu: 0.0.40
codegen_flags: <defaults>
</compile_context>

<pallas_src>
import functools

import jax
import jax.numpy as jnp
from jax.experimental import pallas as pl
from jax.experimental.pallas import tpu as pltpu


LANE = 128
VMEM_LIMIT = 48 * 1024 * 1024      # safe on v7x (64 MiB physical), fine on v5e/v6e


# ----------------------------------------------------------------------------
# small helpers (trace-time only)
# ----------------------------------------------------------------------------

def _pad_to_lane(c):
    return ((c + LANE - 1) // LANE) * LANE


def _pad_axis(a, axis, new_size):
    if a.shape[axis] == new_size:
        return a
    pad = [(0, 0)] * a.ndim
    pad[axis] = (0, new_size - a.shape[axis])
    return jnp.pad(a, pad)


def _fold_bn(bn):
    gamma, beta, mean, var = bn
    scale = gamma / jnp.sqrt(var + 1e-5)
    shift = beta - mean * scale
    return scale, shift


def _fold_conv1x1(w, bn, cin_p):
    """Fold BN into a (cin_true, cout_true) 1x1-conv weight, pad to lane multiples."""
    cout = w.shape[1]
    cout_p = _pad_to_lane(cout)
    scale, shift = _fold_bn(bn)
    wp = _pad_axis(_pad_axis(w * scale[None, :], 0, cin_p), 1, cout_p)
    bp = _pad_axis(shift, 0, cout_p).reshape(1, cout_p)
    return wp.astype(jnp.bfloat16), bp


def _cparams(sem):
    return pltpu.CompilerParams(dimension_semantics=sem,
                                vmem_limit_bytes=VMEM_LIMIT)


def _pick_rows_tile(rows, cap=512):
    """Largest divisor of `rows` that is <= cap and a multiple of 8 (or rows itself)."""
    if rows <= cap:
        return rows
    for d in range(cap, 7, -1):
        if d % 8 == 0 and rows % d == 0:
            return d
    return rows


# ----------------------------------------------------------------------------
# Pallas kernels
# ----------------------------------------------------------------------------

def _mm_bias_act_kernel(x_ref, w_ref, b_ref, o_ref, *, act):
    # x: [TM, K] bf16 ; w: [K, N] bf16 (BN scale folded) ; b: [1, N] f32 (BN shift)
    y = jnp.dot(x_ref[...], w_ref[...], preferred_element_type=jnp.float32)
    y = y + b_ref[...]
    if act == "relu":
        y = jnp.maximum(y, 0.0)
    o_ref[...] = y.astype(o_ref.dtype)


def _conv3x3_s1_bn_relu_kernel(x_ref, w_ref, b_ref, o_ref, pad_ref, pack_ref, *, h, wd):
    # Stride-1 3x3 conv + BN + ReLU.  Zero border handled on the VMEM scratch; the
    # 9 shifted windows are packed along lanes and contracted with a single dot.
    c = x_ref.shape[-1]
    zr = jnp.zeros((1, wd + 2, c), pad_ref.dtype)
    zc = jnp.zeros((h + 2, 1, c), pad_ref.dtype)
    pad_ref[0:1, :, :] = zr
    pad_ref[h + 1:h + 2, :, :] = zr
    pad_ref[:, 0:1, :] = zc
    pad_ref[:, wd + 1:wd + 2, :] = zc
    pad_ref[1:h + 1, 1:wd + 1, :] = x_ref[0]
    t = 0
    for di in range(3):
        for dj in range(3):
            win = pad_ref[di:di + h, dj:dj + wd, :]
            pack_ref[:, t * c:(t + 1) * c] = win.reshape(h * wd, c)
            t += 1
    y = jnp.dot(pack_ref[...], w_ref[...], preferred_element_type=jnp.float32)
    y = y + b_ref[...]
    o_ref[0] = jnp.maximum(y, 0.0).astype(o_ref.dtype)


def _s2_windows(x_ref, s0_ref, s1_ref, oh, ow):
    """Shared stride-2 (k=3, pad=1) window generator.

    x_ref: [1, oh, 2, ow, 2*C] -- free row-major view of (h, w, C) with h=2*oh, w=2*ow.
    Row parity lives on the size-2 outer dim, column parity on the lane halves.
    Yields the 9 unit-stride (oh, ow, C) tap windows (zero-padded border)."""
    c2 = x_ref.shape[-1]
    c = c2 // 2
    zr = jnp.zeros((1, ow + 1, c2), s0_ref.dtype)
    zc = jnp.zeros((oh + 1, 1, c2), s0_ref.dtype)
    for s_ref in (s0_ref, s1_ref):
        s_ref[0:1, :, :] = zr
        s_ref[:, 0:1, :] = zc
    s0_ref[1:oh + 1, 1:ow + 1, :] = x_ref[0, :, 0, :, :]     # even input rows
    s1_ref[1:oh + 1, 1:ow + 1, :] = x_ref[0, :, 1, :, :]     # odd input rows
    for di in range(3):
        src = s0_ref if di == 1 else s1_ref                   # row parity of tap
        rs = 0 if di == 0 else 1
        for dj in range(3):
            lane0 = 0 if dj == 1 else c                        # column parity -> lane half
            cs = 0 if dj == 0 else 1
            yield src[rs:rs + oh, cs:cs + ow, lane0:lane0 + c]


def _conv3x3_s2_bn_relu_kernel(x_ref, w_ref, b_ref, o_ref, s0_ref, s1_ref, pack_ref,
                               *, oh, ow):
    c = x_ref.shape[-1] // 2
    for t, win in enumerate(_s2_windows(x_ref, s0_ref, s1_ref, oh, ow)):
        pack_ref[:, t * c:(t + 1) * c] = win.reshape(oh * ow, c)
    y = jnp.dot(pack_ref[...], w_ref[...], preferred_element_type=jnp.float32)
    y = y + b_ref[...]
    o_ref[0] = jnp.maximum(y, 0.0).astype(o_ref.dtype)


def _maxpool3x3_s2_kernel(x_ref, o_ref, s0_ref, s1_ref, *, oh, ow):
    # 3x3/s2/p1 max-pool; input is post-ReLU so a zero border is equivalent to -inf.
    c = x_ref.shape[-1] // 2
    best = None
    for win in _s2_windows(x_ref, s0_ref, s1_ref, oh, ow):
        w2 = win.reshape(oh * ow, c)
        best = w2 if best is None else jnp.maximum(best, w2)
    o_ref[0] = best.astype(o_ref.dtype)


def _block_tail_kernel(u_ref, w3_ref, b3_ref, se1_ref, se2_ref, *rest,
                       has_down, down_s2):
    # fused: conv3(1x1)+bn3 -> SE (GAP, fc1, relu, fc2, sigmoid) ->
    #        gate * u + identity (optionally identity = downsample conv+bn) -> relu
    if has_down:
        xi_ref, wd_ref, bd_ref, o_ref = rest
    else:
        xi_ref, o_ref = rest
    m = u_ref.shape[1]
    u = jnp.dot(u_ref[0], w3_ref[...], preferred_element_type=jnp.float32) + b3_ref[...]
    pooled = jnp.mean(u, axis=0, keepdims=True)                           # [1, C] GAP
    hidden = jnp.maximum(
        jnp.dot(pooled.astype(jnp.bfloat16), se1_ref[...],
                preferred_element_type=jnp.float32), 0.0)
    gate = jax.nn.sigmoid(
        jnp.dot(hidden.astype(jnp.bfloat16), se2_ref[...],
                preferred_element_type=jnp.float32))                      # [1, C]
    if has_down:
        if down_s2:
            cin = wd_ref.shape[0]
            # stride-2 1x1 conv input = parity-(0,0) plane of the free-reshaped view
            idm = xi_ref[0, :, 0, :, 0:cin].reshape(m, cin)
        else:
            idm = xi_ref[0]
        identity = jnp.dot(idm, wd_ref[...],
                           preferred_element_type=jnp.float32) + bd_ref[...]
    else:
        identity = xi_ref[0].astype(jnp.float32)
    o_ref[0] = jnp.maximum(u * gate + identity, 0.0).astype(o_ref.dtype)


def _mil_head_kernel(x_ref, w_ref, b_ref, o_ref, acc_ref, *, inv_n):
    # blocked over the bag: accumulate per-instance GAP, finalize with the Linear.
    @pl.when(pl.program_id(0) == 0)
    def _():
        acc_ref[...] = jnp.zeros_like(acc_ref)
    acc_ref[...] += jnp.mean(x_ref[0].astype(jnp.float32), axis=0, keepdims=True)
    @pl.when(pl.program_id(0) == pl.num_programs(0) - 1)
    def _():
        bag = acc_ref[...] * inv_n
        o_ref[...] = jnp.dot(bag, w_ref[...],
                             preferred_element_type=jnp.float32) + b_ref[...]


# ----------------------------------------------------------------------------
# pallas_call wrappers
# ----------------------------------------------------------------------------

def _fused_matmul(x2d, w, b, act):
    # x2d: [rows, Kp] bf16 ; w: [Kp, Np] bf16 ; b: [1, Np] f32 -> [rows, Np] bf16
    rows, kp = x2d.shape
    np_ = w.shape[1]
    tm = _pick_rows_tile(rows)
    return pl.pallas_call(
        functools.partial(_mm_bias_act_kernel, act=act),
        grid=(rows // tm,),
        in_specs=[pl.BlockSpec((tm, kp), lambda i: (i, 0)),
                  pl.BlockSpec((kp, np_), lambda i: (0, 0)),
                  pl.BlockSpec((1, np_), lambda i: (0, 0))],
        out_specs=pl.BlockSpec((tm, np_), lambda i: (i, 0)),
        out_shape=jax.ShapeDtypeStruct((rows, np_), jnp.bfloat16),
        compiler_params=_cparams(("parallel",)),
    )(x2d, w, b)


def _conv3x3_s1(x_nhwc, w, b):
    n, h, wd, c = x_nhwc.shape
    cout_p = w.shape[1]
    return pl.pallas_call(
        functools.partial(_conv3x3_s1_bn_relu_kernel, h=h, wd=wd),
        grid=(n,),
        in_specs=[pl.BlockSpec((1, h, wd, c), lambda bi: (bi, 0, 0, 0)),
                  pl.BlockSpec((9 * c, cout_p), lambda bi: (0, 0)),
                  pl.BlockSpec((1, cout_p), lambda bi: (0, 0))],
        out_specs=pl.BlockSpec((1, h * wd, cout_p), lambda bi: (bi, 0, 0)),
        out_shape=jax.ShapeDtypeStruct((n, h * wd, cout_p), jnp.bfloat16),
        scratch_shapes=[pltpu.VMEM((h + 2, wd + 2, c), jnp.bfloat16),
                        pltpu.VMEM((h * wd, 9 * c), jnp.bfloat16)],
        compiler_params=_cparams(("parallel",)),
    )(x_nhwc, w, b)


def _conv3x3_s2(x_view, w, b, c, oh, ow):
    n = x_view.shape[0]
    cout_p = w.shape[1]
    return pl.pallas_call(
        functools.partial(_conv3x3_s2_bn_relu_kernel, oh=oh, ow=ow),
        grid=(n,),
        in_specs=[pl.BlockSpec((1, oh, 2, ow, 2 * c), lambda bi: (bi, 0, 0, 0, 0)),
                  pl.BlockSpec((9 * c, cout_p), lambda bi: (0, 0)),
                  pl.BlockSpec((1, cout_p), lambda bi: (0, 0))],
        out_specs=pl.BlockSpec((1, oh * ow, cout_p), lambda bi: (bi, 0, 0)),
        out_shape=jax.ShapeDtypeStruct((n, oh * ow, cout_p), jnp.bfloat16),
        scratch_shapes=[pltpu.VMEM((oh + 1, ow + 1, 2 * c), jnp.bfloat16),
                        pltpu.VMEM((oh + 1, ow + 1, 2 * c), jnp.bfloat16),
                        pltpu.VMEM((oh * ow, 9 * c), jnp.bfloat16)],
        compiler_params=_cparams(("parallel",)),
    )(x_view, w, b)


def _maxpool_s2(x_view, oh, ow, c):
    n = x_view.shape[0]
    return pl.pallas_call(
        functools.partial(_maxpool3x3_s2_kernel, oh=oh, ow=ow),
        grid=(n,),
        in_specs=[pl.BlockSpec((1, oh, 2, ow, 2 * c), lambda bi: (bi, 0, 0, 0, 0))],
        out_specs=pl.BlockSpec((1, oh * ow, c), lambda bi: (bi, 0, 0)),
        out_shape=jax.ShapeDtypeStruct((n, oh * ow, c), jnp.bfloat16),
        scratch_shapes=[pltpu.VMEM((oh + 1, ow + 1, 2 * c), jnp.bfloat16),
                        pltpu.VMEM((oh + 1, ow + 1, 2 * c), jnp.bfloat16)],
        compiler_params=_cparams(("parallel",)),
    )(x_view)


def se_bottleneck(x, hw, p, stride):
    # x: (n, m_in, cin_p) bf16, channels zero-padded to a lane multiple
    n, m_in, cin_p = x.shape
    h, w = hw

    # conv1 (1x1) + bn1 + relu, batched over n*m rows
    w1, b1 = _fold_conv1x1(p["conv1_w"], p["bn1"], cin_p)
    planes_p = w1.shape[1]
    y = _fused_matmul(x.reshape(n * m_in, cin_p), w1, b1, act="relu")

    # conv2 (3x3, stride) + bn2 + relu: in-kernel padding / parity, tap-packed dot
    planes = p["conv2_w"].shape[1]
    cin2 = p["conv2_w"].shape[0] // 9
    scale2, shift2 = _fold_bn(p["bn2"])
    w2 = p["conv2_w"].reshape(9, cin2, planes) * scale2[None, None, :]
    w2 = _pad_axis(_pad_axis(w2, 1, planes_p), 2, planes_p)
    w2 = w2.reshape(9 * planes_p, planes_p).astype(jnp.bfloat16)
    b2 = _pad_axis(shift2, 0, planes_p).reshape(1, planes_p)
    if stride == 1:
        oh, ow = h, w
        u_in = _conv3x3_s1(y.reshape(n, h, w, planes_p), w2, b2)
    else:
        assert h % 2 == 0 and w % 2 == 0
        oh, ow = h // 2, w // 2
        u_in = _conv3x3_s2(y.reshape(n, oh, 2, ow, 2 * planes_p), w2, b2,
                           planes_p, oh, ow)
    m = oh * ow

    # fused block tail: conv3(1x1)+bn3 + SE + (downsample conv+bn) + residual + relu
    w3, b3 = _fold_conv1x1(p["conv3_w"], p["bn3"], planes_p)
    cout_p = w3.shape[1]
    hid_p = _pad_to_lane(p["se_w1"].shape[1])
    se1 = _pad_axis(_pad_axis(p["se_w1"], 0, cout_p), 1, hid_p).astype(jnp.bfloat16)
    se2 = _pad_axis(_pad_axis(p["se_w2"], 0, hid_p), 1, cout_p).astype(jnp.bfloat16)

    has_down = "down_w" in p
    down_s2 = has_down and stride != 1
    if has_down:
        wd, bd = _fold_conv1x1(p["down_w"], p["down_bn"], cin_p)
        if down_s2:
            xi = x.reshape(n, oh, 2, ow, 2 * cin_p)          # free view, plane read in-kernel
            xi_spec = pl.BlockSpec((1, oh, 2, ow, 2 * cin_p),
                                   lambda b: (b, 0, 0, 0, 0))
        else:
            xi = x
            xi_spec = pl.BlockSpec((1, m, cin_p), lambda b: (b, 0, 0))
        args = (u_in, w3, b3, se1, se2, xi, wd, bd)
        extra = [xi_spec,
                 pl.BlockSpec((cin_p, cout_p), lambda b: (0, 0)),
                 pl.BlockSpec((1, cout_p), lambda b: (0, 0))]
    else:
        args = (u_in, w3, b3, se1, se2, x)
        extra = [pl.BlockSpec((1, m, cout_p), lambda b: (b, 0, 0))]

    out = pl.pallas_call(
        functools.partial(_block_tail_kernel, has_down=has_down, down_s2=down_s2),
        grid=(n,),
        in_specs=[pl.BlockSpec((1, m, planes_p), lambda b: (b, 0, 0)),
                  pl.BlockSpec((planes_p, cout_p), lambda b: (0, 0)),
                  pl.BlockSpec((1, cout_p), lambda b: (0, 0)),
                  pl.BlockSpec((cout_p, hid_p), lambda b: (0, 0)),
                  pl.BlockSpec((hid_p, cout_p), lambda b: (0, 0))] + extra,
        out_specs=pl.BlockSpec((1, m, cout_p), lambda b: (b, 0, 0)),
        out_shape=jax.ShapeDtypeStruct((n, m, cout_p), jnp.bfloat16),
        compiler_params=_cparams(("parallel",)),
    )(*args)
    return out, (oh, ow)


# ----------------------------------------------------------------------------
# Deterministic parameter init (synthetic; shapes follow the module structure)
# ----------------------------------------------------------------------------

LAYERS = (1, 1, 1, 1)   # se_resnet50 would be (3, 4, 6, 3)
BASE = 16               # se_resnet50 would be 64  -> in_features = BASE*8*4
EXPANSION = 4
REDUCTION = 16


def _conv_w(key, kh, kw, cin, cout):
    # rows ordered (kh, kw, cin); PyTorch (cout, cin, kh, kw) weights would need a
    # transpose to this layout.
    return jax.random.normal(key, (kh * kw * cin, cout), jnp.float32) * 0.05


def _bn_params(key, c):
    k1, k2, k3, k4 = jax.random.split(key, 4)
    gamma = 1.0 + 0.1 * jax.random.normal(k1, (c,), jnp.float32)
    beta = 0.1 * jax.random.normal(k2, (c,), jnp.float32)
    mean = 0.1 * jax.random.normal(k3, (c,), jnp.float32)
    var = 1.0 + 0.1 * jnp.abs(jax.random.normal(k4, (c,), jnp.float32))
    return (gamma, beta, mean, var)


def _block_params(key, cin, planes, stride):
    cout = planes * EXPANSION
    hid = max(cout // REDUCTION, 1)
    ks = jax.random.split(key, 10)
    p = {
        "conv1_w": _conv_w(ks[0], 1, 1, cin, planes),
        "bn1": _bn_params(ks[1], planes),
        "conv2_w": _conv_w(ks[2], 3, 3, planes, planes),
        "bn2": _bn_params(ks[3], planes),
        "conv3_w": _conv_w(ks[4], 1, 1, planes, cout),
        "bn3": _bn_params(ks[5], cout),
        "se_w1": _conv_w(ks[6], 1, 1, cout, hid),   # SE fc1 (bias=False)
        "se_w2": _conv_w(ks[7], 1, 1, hid, cout),   # SE fc2 (bias=False)
    }
    if stride != 1 or cin != cout:
        p["down_w"] = _conv_w(ks[8], 1, 1, cin, cout)
        p["down_bn"] = _bn_params(ks[9], cout)
    return p, cout


def init_params(key, num_classes):
    nblocks_total = sum(LAYERS)
    keys = jax.random.split(key, 3 + nblocks_total)
    params = {
        "conv1_w": _conv_w(keys[0], 7, 7, 3, BASE),
        "bn1": _bn_params(keys[1], BASE),
    }
    blocks = []
    cin = BASE
    ki = 2
    for si, (nblocks, s0) in enumerate(zip(LAYERS, (1, 2, 2, 2))):
        planes = BASE * (2 ** si)
        for bi in range(nblocks):
            stride = s0 if bi == 0 else 1
            bp, cin = _block_params(keys[ki], cin, planes, stride)
            ki += 1
            blocks.append((bp, stride))
    params["blocks"] = blocks
    in_features = cin
    kw, kb = jax.random.split(keys[ki], 2)
    params["fc_w"] = jax.random.normal(kw, (in_features, num_classes), jnp.float32) * 0.05
    params["fc_b"] = jax.random.normal(kb, (num_classes,), jnp.float32) * 0.05
    return params


# ----------------------------------------------------------------------------
# Forward pass:  fc(se_resnet(x).mean(dim=0)).unsqueeze(0)
# ----------------------------------------------------------------------------

def se_resnet_mil_forward(params, x_nchw, num_classes):
    x = jnp.transpose(x_nchw.astype(jnp.float32), (0, 2, 3, 1))     # NHWC
    n, H, W, cin = x.shape

    # --- stem: 7x7/s2/p3 conv + BN + ReLU as a lane-dense batched matmul over a tiny
    #     XLA im2col (Cin=3 is NOT padded to 128; K = 147 -> 256).
    k, s, pd = 7, 2, 3
    oh1 = (H + 2 * pd - k) // s + 1
    ow1 = (W + 2 * pd - k) // s + 1
    xp = jnp.pad(x, ((0, 0), (pd, pd), (pd, pd), (0, 0)))
    taps = [xp[:, di:di + (oh1 - 1) * s + 1:s, dj:dj + (ow1 - 1) * s + 1:s, :]
            for di in range(k) for dj in range(k)]
    kp_true = k * k * cin
    kp = _pad_to_lane(kp_true)
    if kp > kp_true:
        taps.append(jnp.zeros((n, oh1, ow1, kp - kp_true), x.dtype))
    patches = jnp.concatenate(taps, axis=-1).reshape(n * oh1 * ow1, kp)
    patches = patches.astype(jnp.bfloat16)

    scale, shift = _fold_bn(params["bn1"])
    base = params["conv1_w"].shape[1]
    base_p = _pad_to_lane(base)
    w_stem = _pad_axis(_pad_axis(params["conv1_w"] * scale[None, :], 0, kp), 1, base_p)
    w_stem = w_stem.astype(jnp.bfloat16)
    b_stem = _pad_axis(shift, 0, base_p).reshape(1, base_p)
    y = _fused_matmul(patches, w_stem, b_stem, act="relu")          # (n*oh1*ow1, 128)

    # --- 3x3/s2/p1 max-pool (in-kernel padding + parity, fed by a free reshape)
    assert oh1 % 2 == 0 and ow1 % 2 == 0
    oh2, ow2 = oh1 // 2, ow1 // 2
    out = _maxpool_s2(y.reshape(n, oh2, 2, ow2, 2 * base_p), oh2, ow2, base_p)
    hw = (oh2, ow2)

    # --- SE-bottleneck stages
    for bp, stride in params["blocks"]:
        out, hw = se_bottleneck(out, hw, bp, stride)

    # --- MIL head: per-instance GAP + mean over instances (dim 0) + Linear
    cfin_p = out.shape[2]
    m = out.shape[1]
    fc_w = _pad_axis(params["fc_w"], 0, cfin_p)
    fc_b = params["fc_b"].reshape(1, num_classes)
    return pl.pallas_call(
        functools.partial(_mil_head_kernel, inv_n=1.0 / n),
        grid=(n,),
        in_specs=[pl.BlockSpec((1, m, cfin_p), lambda b: (b, 0, 0)),
                  pl.BlockSpec((cfin_p, num_classes), lambda b: (0, 0)),
                  pl.BlockSpec((1, num_classes), lambda b: (0, 0))],
        out_specs=pl.BlockSpec((1, num_classes), lambda b: (0, 0)),
        out_shape=jax.ShapeDtypeStruct((1, num_classes), jnp.float32),
        scratch_shapes=[pltpu.VMEM((1, cfin_p), jnp.float32)],
        compiler_params=_cparams(("arbitrary",)),   # reduction over the bag dimension
    )(out, fc_w, fc_b)


if __name__ == "__main__":
    num_classes = 5
    key = jax.random.PRNGKey(0)
    k_params, k_x = jax.random.split(key)

    params = init_params(k_params, num_classes)
    # bag of 2 instances, 3-channel 32x32 images (NCHW, PyTorch convention)
    x = jax.random.normal(k_x, (2, 3, 32, 32), jnp.float32)

    out = se_resnet_mil_forward(params, x, num_classes)
    out = jax.block_until_ready(out)
    assert out.shape == (1, num_classes), out.shape
    assert out.dtype == jnp.float32
    assert bool(jnp.all(jnp.isfinite(out)))
    print("KERNEL_OK")
</pallas_src>

<mosaic_0001>
module attributes {stable_mosaic.version = 11 : i64} {
  func.func @_mm_bias_act_kernel(%arg0: i32, %arg1: memref<512x256xbf16, #tpu.memory_space<vmem>>, %arg2: memref<256x128xbf16, #tpu.memory_space<vmem>>, %arg3: memref<1x128xf32, #tpu.memory_space<vmem>>, %arg4: memref<512x128xbf16, #tpu.memory_space<vmem>>) attributes {dimension_semantics = [#tpu.dimension_semantics<parallel>], iteration_bounds = array<i64: 1>, scalar_prefetch = 0 : i64, scratch_operands = 0 : i64, tpu.core_type = #tpu.core_type<tc>, window_params = [{transform_indices = @transform_0, window_bounds = array<i64: 512, 256>}, {pipeline_mode = #tpu.pipeline_mode<synchronous>, transform_indices = @transform_1, window_bounds = array<i64: 256, 128>}, {pipeline_mode = #tpu.pipeline_mode<synchronous>, transform_indices = @transform_2, window_bounds = array<i64: 1, 128>}, {transform_indices = @transform_3, window_bounds = array<i64: 512, 128>}]} {
    %c0 = arith.constant 0 : index
    %c0_0 = arith.constant 0 : index
    %0 = vector.load %arg1[%c0, %c0_0] : memref<512x256xbf16, #tpu.memory_space<vmem>>, vector<512x256xbf16>
    %c0_1 = arith.constant 0 : index
    %c0_2 = arith.constant 0 : index
    %1 = vector.load %arg2[%c0_1, %c0_2] : memref<256x128xbf16, #tpu.memory_space<vmem>>, vector<256x128xbf16>
    %cst = arith.constant dense<0.000000e+00> : vector<512x128xf32>
    %2 = tpu.matmul %0, %1, %cst {dimension_numbers = #tpu.dot_dimension_numbers<[1], [0], [0], [1], [0, 0, 1, 1], [], []>} : vector<512x256xbf16>, vector<256x128xbf16>, vector<512x128xf32> -> vector<512x128xf32>
    %c0_3 = arith.constant 0 : index
    %c0_4 = arith.constant 0 : index
    %3 = vector.load %arg3[%c0_3, %c0_4] : memref<1x128xf32, #tpu.memory_space<vmem>>, vector<1x128xf32>
    %4 = vector.broadcast %3 : vector<1x128xf32> to vector<512x128xf32>
    %5 = arith.addf %2, %4 : vector<512x128xf32>
    %cst_5 = arith.constant 0.000000e+00 : f32
    %6 = vector.broadcast %cst_5 : f32 to vector<512x128xf32>
    %7 = arith.maximumf %5, %6 : vector<512x128xf32>
    %8 = arith.truncf %7 : vector<512x128xf32> to vector<512x128xbf16>
    %c0_6 = arith.constant 0 : index
    %c0_7 = arith.constant 0 : index
    %9 = vector.load %arg4[%c0_6, %c0_7] : memref<512x128xbf16, #tpu.memory_space<vmem>>, vector<512x128xbf16>
    tpu.vector_store %arg4[%c0_6, %c0_7], %8 {strides = array<i32>} : memref<512x128xbf16, #tpu.memory_space<vmem>>, vector<512x128xbf16>,
    return
  }
  func.func @transform_0(%arg0: i32) -> (i32, i32) {
    %c0_i32 = arith.constant 0 : i32
    %c0_i32_0 = arith.constant 0 : i32
    return %arg0, %c0_i32 : i32, i32
  }
  func.func @transform_1(%arg0: i32) -> (i32, i32) {
    %c0_i32 = arith.constant 0 : i32
    %c0_i32_0 = arith.constant 0 : i32
    %c0_i32_1 = arith.constant 0 : i32
    return %c0_i32, %c0_i32_0 : i32, i32
  }
  func.func @transform_2(%arg0: i32) -> (i32, i32) {
    %c0_i32 = arith.constant 0 : i32
    %c0_i32_0 = arith.constant 0 : i32
    %c0_i32_1 = arith.constant 0 : i32
    return %c0_i32, %c0_i32_0 : i32, i32
  }
  func.func @transform_3(%arg0: i32) -> (i32, i32) {
    %c0_i32 = arith.constant 0 : i32
    %c0_i32_0 = arith.constant 0 : i32
    return %arg0, %c0_i32 : i32, i32
  }
}

</mosaic_0001>

<bundles_post_ra>
// kernel: tpu_custom_call.1
= control target key start
LH: loop header
LB: loop body
LE: loop exit
PB: predicated region body
PF: predicated region fallthrough
CT: control target
= control target key end

     0   :  { %8 = vsyncpa [#allocation3], 0  ;;  %s2049_s0 = inlined_call_operand.hbm [shape: bf16[512,256], index: 0, kind: input, shape index: {}]   ;;  %s2050_s1 = inlined_call_operand.hbm [shape: bf16[256,128], index: 1, kind: input, shape index: {}]   ;;  %s2051_s2 = inlined_call_operand.vmem [shape: f32[1,128], index: 2, kind: input, shape index: {}]   ;;  %s2052_s3 = inlined_call_operand.hbm [shape: bf16[512,128], index: 3, kind: output, shape index: {}]  }
   0x1   :  { %9 = vsyncpa [#allocation6], 0 }
   0x2   :  { %10 = vsyncpa [#allocation4], 0  ;;  %s1878_s12 = smov [#allocation2]   ;;  %s1806_s16 = scalar_lea.hbm %s2049_s0, 8192 }
   0x3   :  { %s16_s13 = sshll.u32 %s1878_s12, 4  ;;  %p1807_p0 = scmp.ne.s32.totalorder %s2049_s0, %s1806_s16  ;;  %s17_s13 = int_to_ptr.vmem [resolvable:$true] %s16_s13 }
   0x4   :  { %p1810_p1 = scmp.lt.u32.totalorder %s1806_s16, %s2049_s0 }
   0x6   :  { %p1812_p2 = pnand %p1810_p1, %p1807_p0 }
   0x8   :  { %1815 = shalt.err (!%p1812_p2)
}
   0x9   :  { %s1816_s21 = scalar_lea.vmem %s17_s13, 8192  ;;  %p1821_p4 = scmp.lt.s32.totalorder %s17_s13, %s17_s13 }
   0xa   :  { %p1817_p3 = scmp.ne.s32.totalorder %s17_s13, %s1816_s21  ;;  %p1822_p5 = scmp.lt.s32.totalorder %s1816_s21, %s1816_s21 }
   0xc   :  { %p1823_p6 = por %p1822_p5, %p1821_p4 }
   0xe   :  { %p1824_p7 = pnand %p1823_p6, %p1817_p3 }
  0x10   :  { %1827 = shalt.err (!%p1824_p7)
}
  0x11   :  { %s1879_s22 = smov 128   ;;  %s1880_s23 = smov 8  }
  0x12   :  { %22 = dma.hbm_to_vmem [thread:$0]  %s2049_s0, 8192, %s17_s13, [#allocation3], %s1879_s22, %s1879_s22, %s1880_s23  }
  0x13   :  { %s1881_s26 = smov [#allocation5]   ;;  %s1828_s30 = scalar_lea.hbm %s2050_s1, 2048 }
  0x14   :  { %s28_s27 = sshll.u32 %s1881_s26, 4  ;;  %p1829_p8 = scmp.ne.s32.totalorder %s2050_s1, %s1828_s30  ;;  %s29_s27 = int_to_ptr.vmem [resolvable:$true] %s28_s27 }
  0x15   :  { %p1832_p9 = scmp.lt.u32.totalorder %s1828_s30, %s2050_s1 }
  0x17   :  { %p1834_p10 = pnand %p1832_p9, %p1829_p8 }
  0x19   :  { %1837 = shalt.err (!%p1834_p10)
}
  0x1a   :  { %s1838_s8 = scalar_lea.vmem %s29_s27, 2048  ;;  %p1843_p12 = scmp.lt.s32.totalorder %s29_s27, %s29_s27 }
  0x1b   :  { %p1839_p11 = scmp.ne.s32.totalorder %s29_s27, %s1838_s8  ;;  %p1844_p13 = scmp.lt.s32.totalorder %s1838_s8, %s1838_s8 }
  0x1d   :  { %p1845_p0 = por %p1844_p13, %p1843_p12 }
  0x1f   :  { %p1846_p1 = pnand %p1845_p0, %p1839_p11 }
  0x21   :  { %1849 = shalt.err (!%p1846_p1)
}
  0x22   :  { %s1882_s0 = smov 64   ;;  %s1883_s9 = smov 4  }
  0x23   :  { %34 = dma.hbm_to_vmem [thread:$0]  %s2050_s1, 2048, %s29_s27, [#allocation6], %s1882_s0, %s1882_s0, %s1883_s9  }
  0x24   :  { %1872 = dma.done.wait [#allocation3], 8192  }
  0x25   :  { %1873 = vsyncadd [#allocation3], 4294959104 }
  0x26   :  { %1874 = dma.done.wait [#allocation6], 2048  }
  0x27   :  { %1875 = vsyncadd [#allocation6], 4294965248  ;;  %v1884_v0 = vmov 0   ;;  %v1694_v1 = vld [vmem:[#allocation5] sm:$0xff]   ;;  %v1695_v2 = vld [vmem:[#allocation5 + $0x8] sm:$0xff]  }
  0x28   :  { %563 = vmatprep.subr.bf16.mxu0 %v1884_v0  ;;  %1654 = vmatprep.subr.bf16.mxu1 %v1884_v0  ;;  %v1696_v3 = vld [vmem:[#allocation5 + $0x10] sm:$0xff]   ;;  %v1697_v4 = vld [vmem:[#allocation5 + $0x18] sm:$0xff]   ;;  %v1698_v5 = vld [vmem:[#allocation5 + $0x20] sm:$0xff]  }
  0x29   :  { %564 = vmatpush1.bf16.msra.mxu0 %v1694_v1  ;;  %1670 = vmatpush1.bf16.msra.mxu1 %v1694_v1  ;;  %v1712_v6 = vld [vmem:[#allocation2 + $0x4] ss:$8 sps:$4 sm:$0xff]   ;;  %v1700_v9 = vld [vmem:[#allocation5 + $0x30] sm:$0xff]   ;;  %v1701_v10 = vld [vmem:[#allocation5 + $0x38] sm:$0xff]  }
  0x2a   :  { %565 = vmatprep.subr.bf16.mxu0 %v1884_v0  ;;  %1655 = vmatprep.subr.bf16.mxu1 %v1884_v0  ;;  %v1699_v7 = vld [vmem:[#allocation5 + $0x28] sm:$0xff]   ;;  %v1702_v11 = vld [vmem:[#allocation5 + $0x40] sm:$0xff]   ;;  %v1704_v13 = vld [vmem:[#allocation5 + $0x50] sm:$0xff]  }
  0x2b   :  { %v1715_v8 = vld [vmem:[#allocation2 + $0x104] ss:$8 sps:$4 sm:$0xff]   ;;  %595 = vmatprep.mubr.bf16.mxu0 %v1712_v6  ;;  %v1705_v14 = vld [vmem:[#allocation5 + $0x58] sm:$0xff]   ;;  %v1708_v17 = vld [vmem:[#allocation5 + $0x70] sm:$0xff]  }
  0x2c   :  { %723 = vmatprep.mubr.bf16.mxu1 %v1715_v8  ;;  %v1703_v12 = vld [vmem:[#allocation5 + $0x48] sm:$0xff]   ;;  %v1706_v15 = vld [vmem:[#allocation5 + $0x60] sm:$0xff]   ;;  %v1709_v18 = vld [vmem:[#allocation5 + $0x78] sm:$0xff]  }
  0x2d   :  { %566 = vmatpush1.bf16.msra.mxu0 %v1695_v2  ;;  %1671 = vmatpush1.bf16.msra.mxu1 %v1695_v2  ;;  %v1707_v16 = vld [vmem:[#allocation5 + $0x68] sm:$0xff]   ;;  %v1716_v21 = vld [vmem:[#allocation2 + $0x14] ss:$8 sps:$4 sm:$0xff]   ;;  %v1720_v23 = vld [vmem:[#allocation2 + $0x10] ss:$8 sps:$4 sm:$0xff]  }
  0x2e   :  { %567 = vmatprep.subr.bf16.mxu0 %v1884_v0  ;;  %1656 = vmatprep.subr.bf16.mxu1 %v1884_v0  ;;  %v1710_v19 = vld [vmem:[#allocation2] ss:$8 sps:$4 sm:$0xff]   ;;  %v1718_v22 = vld [vmem:[#allocation2 + $0x114] ss:$8 sps:$4 sm:$0xff]   ;;  %v1721_v24 = vld [vmem:[#allocation2 + $0x110] ss:$8 sps:$4 sm:$0xff]  }
  0x2f   :  { %v1713_v20 = vld [vmem:[#allocation2 + $0x100] ss:$8 sps:$4 sm:$0xff]   ;;  %v1722_v25 = vld [vmem:[#allocation2 + $0x24] ss:$8 sps:$4 sm:$0xff]   ;;  %v1728_v29 = vld [vmem:[#allocation2 + $0x34] ss:$8 sps:$4 sm:$0xff]  }
  0x30   :  { %v1724_v26 = vld [vmem:[#allocation2 + $0x124] ss:$8 sps:$4 sm:$0xff]   ;;  %v1726_v27 = vld [vmem:[#allocation2 + $0x20] ss:$8 sps:$4 sm:$0xff]   ;;  %v1730_v30 = vld [vmem:[#allocation2 + $0x134] ss:$8 sps:$4 sm:$0xff]  }
  0x31   :  { %568 = vmatpush1.bf16.msra.mxu0 %v1696_v3  ;;  %1672 = vmatpush1.bf16.msra.mxu1 %v1696_v3  ;;  %v1727_v28 = vld [vmem:[#allocation2 + $0x120] ss:$8 sps:$4 sm:$0xff]   ;;  %v1732_v31 = vld [vmem:[#allocation2 + $0x30] ss:$8 sps:$4 sm:$0xff]   ;;  %v1734_v33 = vld [vmem:[#allocation2 + $0x44] ss:$8 sps:$4 sm:$0xff]  }
  0x32   :  { %569 = vmatprep.subr.bf16.mxu0 %v1884_v0  ;;  %1657 = vmatprep.subr.bf16.mxu1 %v1884_v0  ;;  %v1733_v32 = vld [vmem:[#allocation2 + $0x130] ss:$8 sps:$4 sm:$0xff]   ;;  %v1736_v34 = vld [vmem:[#allocation2 + $0x144] ss:$8 sps:$4 sm:$0xff]   ;;  %v1738_v35 = vld [vmem:[#allocation2 + $0x40] ss:$8 sps:$4 sm:$0xff]  }
  0x33   :  { %v1739_v36 = vld [vmem:[#allocation2 + $0x140] ss:$8 sps:$4 sm:$0xff]   ;;  %v1740_v37 = vld [vmem:[#allocation2 + $0x54] ss:$8 sps:$4 sm:$0xff]   ;;  %v1744_v39 = vld [vmem:[#allocation2 + $0x50] ss:$8 sps:$4 sm:$0xff]  }
  0x34   :  { %v1742_v38 = vld [vmem:[#allocation2 + $0x154] ss:$8 sps:$4 sm:$0xff]   ;;  %v1745_v40 = vld [vmem:[#allocation2 + $0x150] ss:$8 sps:$4 sm:$0xff]   ;;  %v1746_v41 = vld [vmem:[#allocation2 + $0x64] ss:$8 sps:$4 sm:$0xff]  }
  0x35   :  { %570 = vmatpush1.bf16.msra.mxu0 %v1697_v4  ;;  %1673 = vmatpush1.bf16.msra.mxu1 %v1697_v4  ;;  %v1748_v42 = vld [vmem:[#allocation2 + $0x164] ss:$8 sps:$4 sm:$0xff]   ;;  %v1750_v43 = vld [vmem:[#allocation2 + $0x60] ss:$8 sps:$4 sm:$0xff]   ;;  %v1752_v45 = vld [vmem:[#allocation2 + $0x74] ss:$8 sps:$4 sm:$0xff]  }
  0x36   :  { %571 = vmatprep.subr.bf16.mxu0 %v1884_v0  ;;  %1658 = vmatprep.subr.bf16.mxu1 %v1884_v0  ;;  %v1751_v44 = vld [vmem:[#allocation2 + $0x160] ss:$8 sps:$4 sm:$0xff]   ;;  %v1754_v46 = vld [vmem:[#allocation2 + $0x174] ss:$8 sps:$4 sm:$0xff]   ;;  %v1756_v47 = vld [vmem:[#allocation2 + $0x70] ss:$8 sps:$4 sm:$0xff]  }
  0x37   :  { %v1757_v48 = vld [vmem:[#allocation2 + $0x170] ss:$8 sps:$4 sm:$0xff]   ;;  %v1758_v49 = vld [vmem:[#allocation2 + $0x84] ss:$8 sps:$4 sm:$0xff]   ;;  %v1762_v51 = vld [vmem:[#allocation2 + $0x80] ss:$8 sps:$4 sm:$0xff]  }
  0x38   :  { %v1760_v50 = vld [vmem:[#allocation2 + $0x184] ss:$8 sps:$4 sm:$0xff]   ;;  %v1763_v52 = vld [vmem:[#allocation2 + $0x180] ss:$8 sps:$4 sm:$0xff]   ;;  %v1764_v53 = vld [vmem:[#allocation2 + $0x94] ss:$8 sps:$4 sm:$0xff]  }
  0x39   :  { %572 = vmatpush1.bf16.msra.mxu0 %v1698_v5  ;;  %1674 = vmatpush1.bf16.msra.mxu1 %v1698_v5  ;;  %v1766_v54 = vld [vmem:[#allocation2 + $0x194] ss:$8 sps:$4 sm:$0xff]   ;;  %v1768_v55 = vld [vmem:[#allocation2 + $0x90] ss:$8 sps:$4 sm:$0xff]   ;;  %v1770_v57 = vld [vmem:[#allocation2 + $0xa4] ss:$8 sps:$4 sm:$0xff]  }
  0x3a   :  { %573 = vmatprep.subr.bf16.mxu0 %v1884_v0  ;;  %1659 = vmatprep.subr.bf16.mxu1 %v1884_v0  ;;  %v1769_v56 = vld [vmem:[#allocation2 + $0x190] ss:$8 sps:$4 sm:$0xff]   ;;  %v1772_v58 = vld [vmem:[#allocation2 + $0x1a4] ss:$8 sps:$4 sm:$0xff]   ;;  %v1774_v59 = vld [vmem:[#allocation2 + $0xa0] ss:$8 sps:$4 sm:$0xff]  }
  0x3b   :  { %v1775_v60 = vld [vmem:[#allocation2 + $0x1a0] ss:$8 sps:$4 sm:$0xff]   ;;  %v1776_v61 = vld [vmem:[#allocation2 + $0xb4] ss:$8 sps:$4 sm:$0xff]   ;;  %v1780_v63 = vld [vmem:[#allocation2 + $0xb0] ss:$8 sps:$4 sm:$0xff]  }
  0x3c   :  { %v1778_v62 = vld [vmem:[#allocation2 + $0x1b4] ss:$8 sps:$4 sm:$0xff]   ;;  %v1782_v1 = vld [vmem:[#allocation2 + $0xc4] ss:$8 sps:$4 sm:$0xff]   ;;  %v1786_v3 = vld [vmem:[#allocation2 + $0xc0] ss:$8 sps:$4 sm:$0xff]  }
  0x3d   :  { %574 = vmatpush1.bf16.msra.mxu0 %v1699_v7  ;;  %1675 = vmatpush1.bf16.msra.mxu1 %v1699_v7  ;;  %v1784_v2 = vld [vmem:[#allocation2 + $0x1c4] ss:$8 sps:$4 sm:$0xff]   ;;  %v1787_v4 = vld [vmem:[#allocation2 + $0x1c0] ss:$8 sps:$4 sm:$0xff]   ;;  %v1788_v5 = vld [vmem:[#allocation2 + $0xd4] ss:$8 sps:$4 sm:$0xff]  }
  0x3e   :  { %575 = vmatprep.subr.bf16.mxu0 %v1884_v0  ;;  %1660 = vmatprep.subr.bf16.mxu1 %v1884_v0  ;;  %v1790_v6 = vld [vmem:[#allocation2 + $0x1d4] ss:$8 sps:$4 sm:$0xff]   ;;  %v1792_v7 = vld [vmem:[#allocation2 + $0xd0] ss:$8 sps:$4 sm:$0xff]  }
  0x3f   :  { %v1793_v8 = vld [vmem:[#allocation2 + $0x1d0] ss:$8 sps:$4 sm:$0xff]  }
  0x41   :  { %576 = vmatpush1.bf16.msra.mxu0 %v1700_v9  ;;  %1676 = vmatpush1.bf16.msra.mxu1 %v1700_v9  ;;  %v1794_v9 = vld [vmem:[#allocation2 + $0xe4] ss:$8 sps:$4 sm:$0xff]  }
  0x42   :  { %577 = vmatprep.subr.bf16.mxu0 %v1884_v0  ;;  %1661 = vmatprep.subr.bf16.mxu1 %v1884_v0 }
  0x45   :  { %578 = vmatpush1.bf16.msra.mxu0 %v1701_v10  ;;  %1677 = vmatpush1.bf16.msra.mxu1 %v1701_v10  ;;  %v1796_v10 = vld [vmem:[#allocation2 + $0x1e4] ss:$8 sps:$4 sm:$0xff]  }
  0x46   :  { %579 = vmatprep.subr.bf16.mxu0 %v1884_v0  ;;  %1662 = vmatprep.subr.bf16.mxu1 %v1884_v0 }
  0x49   :  { %580 = vmatpush1.bf16.msra.mxu0 %v1702_v11  ;;  %1678 = vmatpush1.bf16.msra.mxu1 %v1702_v11  ;;  %v1798_v11 = vld [vmem:[#allocation2 + $0xe0] ss:$8 sps:$4 sm:$0xff]  }
  0x4a   :  { %581 = vmatprep.subr.bf16.mxu0 %v1884_v0  ;;  %1663 = vmatprep.subr.bf16.mxu1 %v1884_v0 }
  0x4d   :  { %582 = vmatpush1.bf16.msra.mxu0 %v1703_v12  ;;  %1679 = vmatpush1.bf16.msra.mxu1 %v1703_v12  ;;  %v1799_v12 = vld [vmem:[#allocation2 + $0x1e0] ss:$8 sps:$4 sm:$0xff]  }
  0x4e   :  { %583 = vmatprep.subr.bf16.mxu0 %v1884_v0  ;;  %1664 = vmatprep.subr.bf16.mxu1 %v1884_v0 }
  0x51   :  { %584 = vmatpush1.bf16.msra.mxu0 %v1704_v13  ;;  %1680 = vmatpush1.bf16.msra.mxu1 %v1704_v13  ;;  %v1800_v13 = vld [vmem:[#allocation2 + $0xf4] ss:$8 sps:$4 sm:$0xff]  }
  0x52   :  { %585 = vmatprep.subr.bf16.mxu0 %v1884_v0  ;;  %1665 = vmatprep.subr.bf16.mxu1 %v1884_v0 }
  0x55   :  { %586 = vmatpush1.bf16.msra.mxu0 %v1705_v14  ;;  %1681 = vmatpush1.bf16.msra.mxu1 %v1705_v14  ;;  %v1802_v14 = vld [vmem:[#allocation2 + $0x1f4] ss:$8 sps:$4 sm:$0xff]  }
  0x56   :  { %587 = vmatprep.subr.bf16.mxu0 %v1884_v0  ;;  %1666 = vmatprep.subr.bf16.mxu1 %v1884_v0 }
  0x59   :  { %588 = vmatpush1.bf16.msra.mxu0 %v1706_v15  ;;  %1682 = vmatpush1.bf16.msra.mxu1 %v1706_v15  ;;  %v1804_v15 = vld [vmem:[#allocation2 + $0xf0] ss:$8 sps:$4 sm:$0xff]  }
  0x5a   :  { %589 = vmatprep.subr.bf16.mxu0 %v1884_v0  ;;  %1667 = vmatprep.subr.bf16.mxu1 %v1884_v0 }
  0x5d   :  { %590 = vmatpush1.bf16.msra.mxu0 %v1707_v16  ;;  %1683 = vmatpush1.bf16.msra.mxu1 %v1707_v16  ;;  %v1805_v16 = vld [vmem:[#allocation2 + $0x1f0] ss:$8 sps:$4 sm:$0xff]  }
  0x5e   :  { %591 = vmatprep.subr.bf16.mxu0 %v1884_v0  ;;  %1668 = vmatprep.subr.bf16.mxu1 %v1884_v0 }
  0x61   :  { %592 = vmatpush1.bf16.msra.mxu0 %v1708_v17  ;;  %1684 = vmatpush1.bf16.msra.mxu1 %v1708_v17  ;;  %v1968_v17 = vld [vmem:[%s2051_s2] ss:$0 sm:$0xff]  ;;  %s1885_s2 = smov [#allocation7]  }
  0x62   :  { %593 = vmatprep.subr.bf16.mxu0 %v1884_v0  ;;  %1669 = vmatprep.subr.bf16.mxu1 %v1884_v0  ;;  %v1781_v0 = vld [vmem:[#allocation2 + $0x1b0] ss:$8 sps:$4 sm:$0xff]   ;;  %s1241_s13 = sshll.u32 %s1885_s2, 4  ;;  %s1242_s13 = int_to_ptr.vmem [resolvable:$true] %s1241_s13 }
  0x63   :  { %s1850_s14 = scalar_lea.vmem %s1242_s13, 4096  ;;  %p1855_p3 = scmp.lt.s32.totalorder %s1242_s13, %s1242_s13 }
  0x64   :  { %p1851_p2 = scmp.ne.s32.totalorder %s1242_s13, %s1850_s14  ;;  %p1856_p4 = scmp.lt.s32.totalorder %s1850_s14, %s1850_s14 }
  0x65   :  { %594 = vmatpush1.bf16.msra.mxu0 %v1709_v18  ;;  %1685 = vmatpush1.bf16.msra.mxu1 %v1709_v18 }
  0x66   :  { %p1857_p5 = por %p1856_p4, %p1855_p3 }
  0x68   :  { %596 = vmatmul.mubr.bf16.vlgmr.msra.gmra.mrb[0].mxu0 %v1710_v19  ;;  %724 = vmatmul.mubr.bf16.vlgmr.msra.gmra.mrb[0].mxu1 %v1713_v20  ;;  %p1858_p6 = pnand %p1857_p5, %p1851_p2 }
  0x69   :  { %603 = vmatprep.mubr.bf16.mxu0 %v1716_v21  ;;  %731 = vmatprep.mubr.bf16.mxu1 %v1718_v22 }
  0x70   :  { %604 = vmatmul.mubr.bf16.gmra.mrb[4].mxu0 %v1720_v23  ;;  %732 = vmatmul.mubr.bf16.gmra.mrb[4].mxu1 %v1721_v24 }
  0x71   :  { %611 = vmatprep.mubr.bf16.mxu0 %v1722_v25  ;;  %739 = vmatprep.mubr.bf16.mxu1 %v1724_v26 }
  0x78   :  { %612 = vmatmul.mubr.bf16.gmra.mrb[8].mxu0 %v1726_v27  ;;  %740 = vmatmul.mubr.bf16.gmra.mrb[8].mxu1 %v1727_v28 }
  0x79   :  { %619 = vmatprep.mubr.bf16.mxu0 %v1728_v29  ;;  %747 = vmatprep.mubr.bf16.mxu1 %v1730_v30 }
  0x80   :  { %620 = vmatmul.mubr.bf16.gmra.mrb[12].mxu0 %v1732_v31  ;;  %748 = vmatmul.mubr.bf16.gmra.mrb[12].mxu1 %v1733_v32 }
  0x81   :  { %627 = vmatprep.mubr.bf16.mxu0 %v1734_v33  ;;  %755 = vmatprep.mubr.bf16.mxu1 %v1736_v34 }
  0x88   :  { %628 = vmatmul.mubr.bf16.gmra.mrb[16].mxu0 %v1738_v35  ;;  %756 = vmatmul.mubr.bf16.gmra.mrb[16].mxu1 %v1739_v36 }
  0x89   :  { %635 = vmatprep.mubr.bf16.mxu0 %v1740_v37  ;;  %763 = vmatprep.mubr.bf16.mxu1 %v1742_v38 }
  0x90   :  { %636 = vmatmul.mubr.bf16.gmra.mrb[20].mxu0 %v1744_v39  ;;  %764 = vmatmul.mubr.bf16.gmra.mrb[20].mxu1 %v1745_v40 }
  0x91   :  { %643 = vmatprep.mubr.bf16.mxu0 %v1746_v41  ;;  %771 = vmatprep.mubr.bf16.mxu1 %v1748_v42 }
  0x98   :  { %644 = vmatmul.mubr.bf16.gmra.mrb[24].mxu0 %v1750_v43  ;;  %772 = vmatmul.mubr.bf16.gmra.mrb[24].mxu1 %v1751_v44 }
  0x99   :  { %651 = vmatprep.mubr.bf16.mxu0 %v1752_v45  ;;  %779 = vmatprep.mubr.bf16.mxu1 %v1754_v46 }
  0xa0   :  { %652 = vmatmul.mubr.bf16.gmra.mrb[28].mxu0 %v1756_v47  ;;  %780 = vmatmul.mubr.bf16.gmra.mrb[28].mxu1 %v1757_v48 }
  0xa1   :  { %659 = vmatprep.mubr.bf16.mxu0 %v1758_v49  ;;  %787 = vmatprep.mubr.bf16.mxu1 %v1760_v50 }
  0xa8   :  { %660 = vmatmul.mubr.bf16.gmra.mrb[32].mxu0 %v1762_v51  ;;  %788 = vmatmul.mubr.bf16.gmra.mrb[32].mxu1 %v1763_v52 }
  0xa9   :  { %667 = vmatprep.mubr.bf16.mxu0 %v1764_v53  ;;  %795 = vmatprep.mubr.bf16.mxu1 %v1766_v54 }
  0xb0   :  { %668 = vmatmul.mubr.bf16.gmra.mrb[36].mxu0 %v1768_v55  ;;  %796 = vmatmul.mubr.bf16.gmra.mrb[36].mxu1 %v1769_v56 }
  0xb1   :  { %675 = vmatprep.mubr.bf16.mxu0 %v1770_v57  ;;  %803 = vmatprep.mubr.bf16.mxu1 %v1772_v58 }
  0xb8   :  { %676 = vmatmul.mubr.bf16.gmra.mrb[40].mxu0 %v1774_v59  ;;  %804 = vmatmul.mubr.bf16.gmra.mrb[40].mxu1 %v1775_v60 }
  0xb9   :  { %683 = vmatprep.mubr.bf16.mxu0 %v1776_v61  ;;  %811 = vmatprep.mubr.bf16.mxu1 %v1778_v62 }
  0xc0   :  { %684 = vmatmul.mubr.bf16.gmra.mrb[44].mxu0 %v1780_v63  ;;  %812 = vmatmul.mubr.bf16.gmra.mrb[44].mxu1 %v1781_v0 }
  0xc1   :  { %691 = vmatprep.mubr.bf16.mxu0 %v1782_v1  ;;  %819 = vmatprep.mubr.bf16.mxu1 %v1784_v2 }
  0xc8   :  { %692 = vmatmul.mubr.bf16.gmra.mrb[48].mxu0 %v1786_v3  ;;  %820 = vmatmul.mubr.bf16.gmra.mrb[48].mxu1 %v1787_v4 }
  0xc9   :  { %699 = vmatprep.mubr.bf16.mxu0 %v1788_v5  ;;  %827 = vmatprep.mubr.bf16.mxu1 %v1790_v6 }
  0xd0   :  { %700 = vmatmul.mubr.bf16.gmra.mrb[52].mxu0 %v1792_v7  ;;  %828 = vmatmul.mubr.bf16.gmra.mrb[52].mxu1 %v1793_v8 }
  0xd1   :  { %707 = vmatprep.mubr.bf16.mxu0 %v1794_v9  ;;  %835 = vmatprep.mubr.bf16.mxu1 %v1796_v10 }
  0xd8   :  { %708 = vmatmul.mubr.bf16.gmra.mrb[56].mxu0 %v1798_v11  ;;  %836 = vmatmul.mubr.bf16.gmra.mrb[56].mxu1 %v1799_v12 }
  0xd9   :  { %715 = vmatprep.mubr.bf16.mxu0 %v1800_v13  ;;  %843 = vmatprep.mubr.bf16.mxu1 %v1802_v14 }
  0xe0   :  { %716 = vmatmul.mubr.bf16.gmra.mrb[60].mxu0 %v1804_v15  ;;  %844 = vmatmul.mubr.bf16.gmra.mrb[60].mxu1 %v1805_v16 }
 0x13b   :  { %v597_v18 = vpop.f32.mrb[0].mxu0  ;;  %v725_v19 = vpop.f32.mrb[0].mxu1 }
 0x13c   :  { %v598_v20 = vadd.f32 %v1968_v17, %v597_v18  ;;  %v726_v21 = vadd.f32 %v1968_v17, %v725_v19  ;;  %v599_v22 = vpop.f32.mrb[1].mxu0  ;;  %v727_v23 = vpop.f32.mrb[1].mxu1 }
 0x13d   :  { %v600_v24 = vpop.f32.mrb[2].mxu0  ;;  %v728_v25 = vpop.f32.mrb[2].mxu1 }
 0x13e   :  { %v601_v26 = vadd.f32 %v1968_v17, %v600_v24  ;;  %v729_v27 = vadd.f32 %v1968_v17, %v728_v25  ;;  %v602_v28 = vpop.f32.mrb[3].mxu0  ;;  %v730_v29 = vpop.f32.mrb[3].mxu1  ;;  %v852_v30 = vmax.f32 %v598_v20, 0.0  ;;  %v884_v31 = vmax.f32 %v726_v21, 0.0 }
 0x140   :  { %v853_v32 = vmax.f32 %v601_v26, 0.0  ;;  %v885_v33 = vmax.f32 %v729_v27, 0.0 }
 0x142   :  { %v1466_v34 = vpack.c.bf16 %v853_v32, %v852_v30  ;;  %v1546_v35 = vpack.c.bf16 %v885_v33, %v884_v31 }
 0x143   :  { %v605_v36 = vpop.f32.mrb[4].mxu0  ;;  %v733_v37 = vpop.f32.mrb[4].mxu1 }
 0x144   :  { %1467 = vst [vmem:[#allocation7] sm:$0xff] %v1466_v34   ;;  %1638 = vst [vmem:[#allocation7 + $0x80] sm:$0xff] %v1546_v35   ;;  %v606_v38 = vadd.f32 %v1968_v17, %v605_v36  ;;  %v734_v39 = vadd.f32 %v1968_v17, %v733_v37  ;;  %v607_v40 = vpop.f32.mrb[5].mxu0  ;;  %v735_v41 = vpop.f32.mrb[5].mxu1 }
 0x145   :  { %v608_v42 = vpop.f32.mrb[6].mxu0  ;;  %v736_v43 = vpop.f32.mrb[6].mxu1 }
 0x146   :  { %v609_v44 = vadd.f32 %v1968_v17, %v608_v42  ;;  %v737_v45 = vadd.f32 %v1968_v17, %v736_v43  ;;  %v610_v46 = vpop.f32.mrb[7].mxu0  ;;  %v738_v47 = vpop.f32.mrb[7].mxu1  ;;  %v854_v48 = vmax.f32 %v606_v38, 0.0  ;;  %v886_v49 = vmax.f32 %v734_v39, 0.0 }
 0x148   :  { %v855_v50 = vmax.f32 %v609_v44, 0.0  ;;  %v887_v51 = vmax.f32 %v737_v45, 0.0 }
 0x14a   :  { %v1471_v52 = vpack.c.bf16 %v855_v50, %v854_v48  ;;  %v1551_v53 = vpack.c.bf16 %v887_v51, %v886_v49 }
 0x14b   :  { %v613_v54 = vpop.f32.mrb[8].mxu0  ;;  %v741_v55 = vpop.f32.mrb[8].mxu1 }
 0x14c   :  { %1623 = vst [vmem:[#allocation7 + $0x8] sm:$0xff] %v1471_v52   ;;  %1639 = vst [vmem:[#allocation7 + $0x88] sm:$0xff] %v1551_v53   ;;  %v614_v56 = vadd.f32 %v1968_v17, %v613_v54  ;;  %v742_v57 = vadd.f32 %v1968_v17, %v741_v55  ;;  %v615_v58 = vpop.f32.mrb[9].mxu0  ;;  %v743_v59 = vpop.f32.mrb[9].mxu1 }
 0x14d   :  { %v616_v60 = vpop.f32.mrb[10].mxu0  ;;  %v744_v61 = vpop.f32.mrb[10].mxu1 }
 0x14e   :  { %v617_v62 = vadd.f32 %v1968_v17, %v616_v60  ;;  %v745_v63 = vadd.f32 %v1968_v17, %v744_v61  ;;  %v618_v0 = vpop.f32.mrb[11].mxu0  ;;  %v746_v1 = vpop.f32.mrb[11].mxu1  ;;  %v856_v2 = vmax.f32 %v614_v56, 0.0  ;;  %v888_v3 = vmax.f32 %v742_v57, 0.0 }
 0x150   :  { %v857_v4 = vmax.f32 %v617_v62, 0.0  ;;  %v889_v5 = vmax.f32 %v745_v63, 0.0 }
 0x152   :  { %v1476_v6 = vpack.c.bf16 %v857_v4, %v856_v2  ;;  %v1556_v7 = vpack.c.bf16 %v889_v5, %v888_v3 }
 0x153   :  { %v621_v8 = vpop.f32.mrb[12].mxu0  ;;  %v749_v9 = vpop.f32.mrb[12].mxu1 }
 0x154   :  { %1624 = vst [vmem:[#allocation7 + $0x10] sm:$0xff] %v1476_v6   ;;  %1640 = vst [vmem:[#allocation7 + $0x90] sm:$0xff] %v1556_v7   ;;  %v622_v10 = vadd.f32 %v1968_v17, %v621_v8  ;;  %v750_v11 = vadd.f32 %v1968_v17, %v749_v9  ;;  %v623_v12 = vpop.f32.mrb[13].mxu0  ;;  %v751_v13 = vpop.f32.mrb[13].mxu1 }
 0x155   :  { %v624_v14 = vpop.f32.mrb[14].mxu0  ;;  %v752_v15 = vpop.f32.mrb[14].mxu1 }
 0x156   :  { %v625_v16 = vadd.f32 %v1968_v17, %v624_v14  ;;  %v753_v18 = vadd.f32 %v1968_v17, %v752_v15  ;;  %v626_v19 = vpop.f32.mrb[15].mxu0  ;;  %v754_v20 = vpop.f32.mrb[15].mxu1  ;;  %v858_v21 = vmax.f32 %v622_v10, 0.0  ;;  %v890_v22 = vmax.f32 %v750_v11, 0.0 }
 0x158   :  { %v859_v23 = vmax.f32 %v625_v16, 0.0  ;;  %v891_v24 = vmax.f32 %v753_v18, 0.0 }
 0x15a   :  { %v1481_v25 = vpack.c.bf16 %v859_v23, %v858_v21  ;;  %v1561_v26 = vpack.c.bf16 %v891_v24, %v890_v22 }
 0x15b   :  { %v629_v27 = vpop.f32.mrb[16].mxu0  ;;  %v757_v28 = vpop.f32.mrb[16].mxu1 }
 0x15c   :  { %1625 = vst [vmem:[#allocation7 + $0x18] sm:$0xff] %v1481_v25   ;;  %1641 = vst [vmem:[#allocation7 + $0x98] sm:$0xff] %v1561_v26   ;;  %v630_v29 = vadd.f32 %v1968_v17, %v629_v27  ;;  %v758_v30 = vadd.f32 %v1968_v17, %v757_v28  ;;  %v631_v31 = vpop.f32.mrb[17].mxu0  ;;  %v759_v32 = vpop.f32.mrb[17].mxu1 }
 0x15d   :  { %v632_v33 = vpop.f32.mrb[18].mxu0  ;;  %v760_v34 = vpop.f32.mrb[18].mxu1 }
 0x15e   :  { %v633_v35 = vadd.f32 %v1968_v17, %v632_v33  ;;  %v761_v36 = vadd.f32 %v1968_v17, %v760_v34  ;;  %v634_v37 = vpop.f32.mrb[19].mxu0  ;;  %v762_v38 = vpop.f32.mrb[19].mxu1  ;;  %v860_v39 = vmax.f32 %v630_v29, 0.0  ;;  %v892_v40 = vmax.f32 %v758_v30, 0.0 }
 0x160   :  { %v861_v41 = vmax.f32 %v633_v35, 0.0  ;;  %v893_v42 = vmax.f32 %v761_v36, 0.0 }
 0x162   :  { %v1486_v43 = vpack.c.bf16 %v861_v41, %v860_v39  ;;  %v1566_v44 = vpack.c.bf16 %v893_v42, %v892_v40 }
 0x163   :  { %v637_v45 = vpop.f32.mrb[20].mxu0  ;;  %v765_v46 = vpop.f32.mrb[20].mxu1 }
 0x164   :  { %1626 = vst [vmem:[#allocation7 + $0x20] sm:$0xff] %v1486_v43   ;;  %1642 = vst [vmem:[#allocation7 + $0xa0] sm:$0xff] %v1566_v44   ;;  %v638_v47 = vadd.f32 %v1968_v17, %v637_v45  ;;  %v766_v48 = vadd.f32 %v1968_v17, %v765_v46  ;;  %v639_v49 = vpop.f32.mrb[21].mxu0  ;;  %v767_v50 = vpop.f32.mrb[21].mxu1 }
 0x165   :  { %v640_v51 = vpop.f32.mrb[22].mxu0  ;;  %v768_v52 = vpop.f32.mrb[22].mxu1 }
 0x166   :  { %v641_v53 = vadd.f32 %v1968_v17, %v640_v51  ;;  %v769_v54 = vadd.f32 %v1968_v17, %v768_v52  ;;  %v642_v55 = vpop.f32.mrb[23].mxu0  ;;  %v770_v56 = vpop.f32.mrb[23].mxu1  ;;  %v862_v57 = vmax.f32 %v638_v47, 0.0  ;;  %v894_v58 = vmax.f32 %v766_v48, 0.0 }
 0x168   :  { %v863_v59 = vmax.f32 %v641_v53, 0.0  ;;  %v895_v60 = vmax.f32 %v769_v54, 0.0 }
 0x16a   :  { %v1491_v61 = vpack.c.bf16 %v863_v59, %v862_v57  ;;  %v1571_v62 = vpack.c.bf16 %v895_v60, %v894_v58 }
 0x16b   :  { %v645_v63 = vpop.f32.mrb[24].mxu0  ;;  %v773_v0 = vpop.f32.mrb[24].mxu1 }
 0x16c   :  { %1627 = vst [vmem:[#allocation7 + $0x28] sm:$0xff] %v1491_v61   ;;  %1643 = vst [vmem:[#allocation7 + $0xa8] sm:$0xff] %v1571_v62   ;;  %v646_v1 = vadd.f32 %v1968_v17, %v645_v63  ;;  %v774_v2 = vadd.f32 %v1968_v17, %v773_v0  ;;  %v647_v3 = vpop.f32.mrb[25].mxu0  ;;  %v775_v4 = vpop.f32.mrb[25].mxu1 }
 0x16d   :  { %v648_v5 = vpop.f32.mrb[26].mxu0  ;;  %v776_v6 = vpop.f32.mrb[26].mxu1 }
 0x16e   :  { %v649_v7 = vadd.f32 %v1968_v17, %v648_v5  ;;  %v777_v8 = vadd.f32 %v1968_v17, %v776_v6  ;;  %v650_v9 = vpop.f32.mrb[27].mxu0  ;;  %v778_v10 = vpop.f32.mrb[27].mxu1  ;;  %v864_v11 = vmax.f32 %v646_v1, 0.0  ;;  %v896_v12 = vmax.f32 %v774_v2, 0.0 }
 0x170   :  { %v865_v13 = vmax.f32 %v649_v7, 0.0  ;;  %v897_v14 = vmax.f32 %v777_v8, 0.0 }
 0x172   :  { %v1496_v15 = vpack.c.bf16 %v865_v13, %v864_v11  ;;  %v1576_v16 = vpack.c.bf16 %v897_v14, %v896_v12 }
 0x173   :  { %v653_v18 = vpop.f32.mrb[28].mxu0  ;;  %v781_v19 = vpop.f32.mrb[28].mxu1 }
 0x174   :  { %1628 = vst [vmem:[#allocation7 + $0x30] sm:$0xff] %v1496_v15   ;;  %1644 = vst [vmem:[#allocation7 + $0xb0] sm:$0xff] %v1576_v16   ;;  %v654_v20 = vadd.f32 %v1968_v17, %v653_v18  ;;  %v782_v21 = vadd.f32 %v1968_v17, %v781_v19  ;;  %v655_v22 = vpop.f32.mrb[29].mxu0  ;;  %v783_v23 = vpop.f32.mrb[29].mxu1 }
 0x175   :  { %v656_v24 = vpop.f32.mrb[30].mxu0  ;;  %v784_v25 = vpop.f32.mrb[30].mxu1 }
 0x176   :  { %v657_v26 = vadd.f32 %v1968_v17, %v656_v24  ;;  %v785_v27 = vadd.f32 %v1968_v17, %v784_v25  ;;  %v658_v28 = vpop.f32.mrb[31].mxu0  ;;  %v786_v29 = vpop.f32.mrb[31].mxu1  ;;  %v866_v30 = vmax.f32 %v654_v20, 0.0  ;;  %v898_v31 = vmax.f32 %v782_v21, 0.0 }
 0x178   :  { %v867_v32 = vmax.f32 %v657_v26, 0.0  ;;  %v899_v33 = vmax.f32 %v785_v27, 0.0 }
 0x17a   :  { %v1501_v34 = vpack.c.bf16 %v867_v32, %v866_v30  ;;  %v1581_v35 = vpack.c.bf16 %v899_v33, %v898_v31 }
 0x17b   :  { %v661_v36 = vpop.f32.mrb[32].mxu0  ;;  %v789_v37 = vpop.f32.mrb[32].mxu1 }
 0x17c   :  { %1629 = vst [vmem:[#allocation7 + $0x38] sm:$0xff] %v1501_v34   ;;  %1645 = vst [vmem:[#allocation7 + $0xb8] sm:$0xff] %v1581_v35   ;;  %v662_v38 = vadd.f32 %v1968_v17, %v661_v36  ;;  %v790_v39 = vadd.f32 %v1968_v17, %v789_v37  ;;  %v663_v40 = vpop.f32.mrb[33].mxu0  ;;  %v791_v41 = vpop.f32.mrb[33].mxu1 }
 0x17d   :  { %v664_v42 = vpop.f32.mrb[34].mxu0  ;;  %v792_v43 = vpop.f32.mrb[34].mxu1 }
 0x17e   :  { %v665_v44 = vadd.f32 %v1968_v17, %v664_v42  ;;  %v793_v45 = vadd.f32 %v1968_v17, %v792_v43  ;;  %v666_v46 = vpop.f32.mrb[35].mxu0  ;;  %v794_v47 = vpop.f32.mrb[35].mxu1  ;;  %v868_v48 = vmax.f32 %v662_v38, 0.0  ;;  %v900_v49 = vmax.f32 %v790_v39, 0.0 }
 0x180   :  { %v869_v50 = vmax.f32 %v665_v44, 0.0  ;;  %v901_v51 = vmax.f32 %v793_v45, 0.0 }
 0x182   :  { %v1506_v52 = vpack.c.bf16 %v869_v50, %v868_v48  ;;  %v1586_v53 = vpack.c.bf16 %v901_v51, %v900_v49 }
 0x183   :  { %v669_v54 = vpop.f32.mrb[36].mxu0  ;;  %v797_v55 = vpop.f32.mrb[36].mxu1 }
 0x184   :  { %1630 = vst [vmem:[#allocation7 + $0x40] sm:$0xff] %v1506_v52   ;;  %1646 = vst [vmem:[#allocation7 + $0xc0] sm:$0xff] %v1586_v53   ;;  %v670_v56 = vadd.f32 %v1968_v17, %v669_v54  ;;  %v798_v57 = vadd.f32 %v1968_v17, %v797_v55  ;;  %v671_v58 = vpop.f32.mrb[37].mxu0  ;;  %v799_v59 = vpop.f32.mrb[37].mxu1 }
 0x185   :  { %v672_v60 = vpop.f32.mrb[38].mxu0  ;;  %v800_v61 = vpop.f32.mrb[38].mxu1 }
 0x186   :  { %v673_v62 = vadd.f32 %v1968_v17, %v672_v60  ;;  %v801_v63 = vadd.f32 %v1968_v17, %v800_v61  ;;  %v674_v0 = vpop.f32.mrb[39].mxu0  ;;  %v802_v1 = vpop.f32.mrb[39].mxu1  ;;  %v870_v2 = vmax.f32 %v670_v56, 0.0  ;;  %v902_v3 = vmax.f32 %v798_v57, 0.0 }
 0x188   :  { %v871_v4 = vmax.f32 %v673_v62, 0.0  ;;  %v903_v5 = vmax.f32 %v801_v63, 0.0 }
 0x18a   :  { %v1511_v6 = vpack.c.bf16 %v871_v4, %v870_v2  ;;  %v1591_v7 = vpack.c.bf16 %v903_v5, %v902_v3 }
 0x18b   :  { %v677_v8 = vpop.f32.mrb[40].mxu0  ;;  %v805_v9 = vpop.f32.mrb[40].mxu1 }
 0x18c   :  { %1631 = vst [vmem:[#allocation7 + $0x48] sm:$0xff] %v1511_v6   ;;  %1647 = vst [vmem:[#allocation7 + $0xc8] sm:$0xff] %v1591_v7   ;;  %v678_v10 = vadd.f32 %v1968_v17, %v677_v8  ;;  %v806_v11 = vadd.f32 %v1968_v17, %v805_v9  ;;  %v679_v12 = vpop.f32.mrb[41].mxu0  ;;  %v807_v13 = vpop.f32.mrb[41].mxu1 }
 0x18d   :  { %v680_v14 = vpop.f32.mrb[42].mxu0  ;;  %v808_v15 = vpop.f32.mrb[42].mxu1 }
 0x18e   :  { %v681_v16 = vadd.f32 %v1968_v17, %v680_v14  ;;  %v809_v18 = vadd.f32 %v1968_v17, %v808_v15  ;;  %v682_v19 = vpop.f32.mrb[43].mxu0  ;;  %v810_v20 = vpop.f32.mrb[43].mxu1  ;;  %v872_v21 = vmax.f32 %v678_v10, 0.0  ;;  %v904_v22 = vmax.f32 %v806_v11, 0.0 }
 0x190   :  { %v873_v23 = vmax.f32 %v681_v16, 0.0  ;;  %v905_v24 = vmax.f32 %v809_v18, 0.0 }
 0x192   :  { %v1516_v25 = vpack.c.bf16 %v873_v23, %v872_v21  ;;  %v1596_v26 = vpack.c.bf16 %v905_v24, %v904_v22 }
 0x193   :  { %v685_v27 = vpop.f32.mrb[44].mxu0  ;;  %v813_v28 = vpop.f32.mrb[44].mxu1 }
 0x194   :  { %1632 = vst [vmem:[#allocation7 + $0x50] sm:$0xff] %v1516_v25   ;;  %1648 = vst [vmem:[#allocation7 + $0xd0] sm:$0xff] %v1596_v26   ;;  %v686_v29 = vadd.f32 %v1968_v17, %v685_v27  ;;  %v814_v30 = vadd.f32 %v1968_v17, %v813_v28  ;;  %v687_v31 = vpop.f32.mrb[45].mxu0  ;;  %v815_v32 = vpop.f32.mrb[45].mxu1 }
 0x195   :  { %v688_v33 = vpop.f32.mrb[46].mxu0  ;;  %v816_v34 = vpop.f32.mrb[46].mxu1 }
 0x196   :  { %v689_v35 = vadd.f32 %v1968_v17, %v688_v33  ;;  %v817_v36 = vadd.f32 %v1968_v17, %v816_v34  ;;  %v690_v37 = vpop.f32.mrb[47].mxu0  ;;  %v818_v38 = vpop.f32.mrb[47].mxu1  ;;  %v874_v39 = vmax.f32 %v686_v29, 0.0  ;;  %v906_v40 = vmax.f32 %v814_v30, 0.0 }
 0x198   :  { %v875_v41 = vmax.f32 %v689_v35, 0.0  ;;  %v907_v42 = vmax.f32 %v817_v36, 0.0 }
 0x19a   :  { %v1521_v43 = vpack.c.bf16 %v875_v41, %v874_v39  ;;  %v1601_v44 = vpack.c.bf16 %v907_v42, %v906_v40 }
 0x19b   :  { %v693_v45 = vpop.f32.mrb[48].mxu0  ;;  %v821_v46 = vpop.f32.mrb[48].mxu1 }
 0x19c   :  { %1633 = vst [vmem:[#allocation7 + $0x58] sm:$0xff] %v1521_v43   ;;  %1649 = vst [vmem:[#allocation7 + $0xd8] sm:$0xff] %v1601_v44   ;;  %v694_v47 = vadd.f32 %v1968_v17, %v693_v45  ;;  %v822_v48 = vadd.f32 %v1968_v17, %v821_v46  ;;  %v695_v49 = vpop.f32.mrb[49].mxu0  ;;  %v823_v50 = vpop.f32.mrb[49].mxu1 }
 0x19d   :  { %v696_v51 = vpop.f32.mrb[50].mxu0  ;;  %v824_v52 = vpop.f32.mrb[50].mxu1 }
 0x19e   :  { %v697_v53 = vadd.f32 %v1968_v17, %v696_v51  ;;  %v825_v54 = vadd.f32 %v1968_v17, %v824_v52  ;;  %v698_v55 = vpop.f32.mrb[51].mxu0  ;;  %v826_v56 = vpop.f32.mrb[51].mxu1  ;;  %v876_v57 = vmax.f32 %v694_v47, 0.0  ;;  %v908_v58 = vmax.f32 %v822_v48, 0.0 }
 0x1a0   :  { %v877_v59 = vmax.f32 %v697_v53, 0.0  ;;  %v909_v60 = vmax.f32 %v825_v54, 0.0 }
 0x1a2   :  { %v1526_v61 = vpack.c.bf16 %v877_v59, %v876_v57  ;;  %v1606_v62 = vpack.c.bf16 %v909_v60, %v908_v58 }
 0x1a3   :  { %v701_v63 = vpop.f32.mrb[52].mxu0  ;;  %v829_v0 = vpop.f32.mrb[52].mxu1 }
 0x1a4   :  { %1634 = vst [vmem:[#allocation7 + $0x60] sm:$0xff] %v1526_v61   ;;  %1650 = vst [vmem:[#allocation7 + $0xe0] sm:$0xff] %v1606_v62   ;;  %v702_v1 = vadd.f32 %v1968_v17, %v701_v63  ;;  %v830_v2 = vadd.f32 %v1968_v17, %v829_v0  ;;  %v703_v3 = vpop.f32.mrb[53].mxu0  ;;  %v831_v4 = vpop.f32.mrb[53].mxu1 }
 0x1a5   :  { %v704_v5 = vpop.f32.mrb[54].mxu0  ;;  %v832_v6 = vpop.f32.mrb[54].mxu1 }
 0x1a6   :  { %v705_v7 = vadd.f32 %v1968_v17, %v704_v5  ;;  %v833_v8 = vadd.f32 %v1968_v17, %v832_v6  ;;  %v706_v9 = vpop.f32.mrb[55].mxu0  ;;  %v834_v10 = vpop.f32.mrb[55].mxu1  ;;  %v878_v11 = vmax.f32 %v702_v1, 0.0  ;;  %v910_v12 = vmax.f32 %v830_v2, 0.0 }
 0x1a8   :  { %v879_v13 = vmax.f32 %v705_v7, 0.0  ;;  %v911_v14 = vmax.f32 %v833_v8, 0.0 }
 0x1aa   :  { %v1531_v15 = vpack.c.bf16 %v879_v13, %v878_v11  ;;  %v1611_v16 = vpack.c.bf16 %v911_v14, %v910_v12 }
 0x1ab   :  { %v709_v18 = vpop.f32.mrb[56].mxu0  ;;  %v837_v19 = vpop.f32.mrb[56].mxu1 }
 0x1ac   :  { %1635 = vst [vmem:[#allocation7 + $0x68] sm:$0xff] %v1531_v15   ;;  %1651 = vst [vmem:[#allocation7 + $0xe8] sm:$0xff] %v1611_v16   ;;  %v710_v20 = vadd.f32 %v1968_v17, %v709_v18  ;;  %v838_v21 = vadd.f32 %v1968_v17, %v837_v19  ;;  %v711_v22 = vpop.f32.mrb[57].mxu0  ;;  %v839_v23 = vpop.f32.mrb[57].mxu1 }
 0x1ad   :  { %v712_v24 = vpop.f32.mrb[58].mxu0  ;;  %v840_v25 = vpop.f32.mrb[58].mxu1 }
 0x1ae   :  { %v713_v26 = vadd.f32 %v1968_v17, %v712_v24  ;;  %v841_v27 = vadd.f32 %v1968_v17, %v840_v25  ;;  %v714_v28 = vpop.f32.mrb[59].mxu0  ;;  %v842_v29 = vpop.f32.mrb[59].mxu1  ;;  %v880_v30 = vmax.f32 %v710_v20, 0.0  ;;  %v912_v31 = vmax.f32 %v838_v21, 0.0 }
 0x1b0   :  { %v881_v32 = vmax.f32 %v713_v26, 0.0  ;;  %v913_v33 = vmax.f32 %v841_v27, 0.0 }
 0x1b2   :  { %v1536_v34 = vpack.c.bf16 %v881_v32, %v880_v30  ;;  %v1616_v35 = vpack.c.bf16 %v913_v33, %v912_v31 }
 0x1b3   :  { %v717_v36 = vpop.f32.mrb[60].mxu0  ;;  %v845_v37 = vpop.f32.mrb[60].mxu1 }
 0x1b4   :  { %1636 = vst [vmem:[#allocation7 + $0x70] sm:$0xff] %v1536_v34   ;;  %1652 = vst [vmem:[#allocation7 + $0xf0] sm:$0xff] %v1616_v35   ;;  %v718_v38 = vadd.f32 %v1968_v17, %v717_v36  ;;  %v846_v39 = vadd.f32 %v1968_v17, %v845_v37  ;;  %v719_v40 = vpop.f32.mrb[61].mxu0  ;;  %v847_v41 = vpop.f32.mrb[61].mxu1 }
 0x1b5   :  { %v720_v42 = vpop.f32.mrb[62].mxu0  ;;  %v848_v43 = vpop.f32.mrb[62].mxu1 }
 0x1b6   :  { %v721_v44 = vadd.f32 %v1968_v17, %v720_v42  ;;  %v849_v45 = vadd.f32 %v1968_v17, %v848_v43  ;;  %v722_v46 = vpop.f32.mrb[63].mxu0  ;;  %v850_v47 = vpop.f32.mrb[63].mxu1  ;;  %v882_v48 = vmax.f32 %v718_v38, 0.0  ;;  %v914_v49 = vmax.f32 %v846_v39, 0.0 }
 0x1b8   :  { %v883_v50 = vmax.f32 %v721_v44, 0.0  ;;  %v915_v51 = vmax.f32 %v849_v45, 0.0 }
 0x1ba   :  { %v1541_v52 = vpack.c.bf16 %v883_v50, %v882_v48  ;;  %v1621_v53 = vpack.c.bf16 %v915_v51, %v914_v49 }
 0x1bc   :  { %1637 = vst [vmem:[#allocation7 + $0x78] sm:$0xff] %v1541_v52   ;;  %1653 = vst [vmem:[#allocation7 + $0xf8] sm:$0xff] %v1621_v53  }
 0x1bd   :  { %1861 = shalt.err (!%p1858_p6)
}
 0x1be   :  { %s1862_s17 = scalar_lea.hbm %s2052_s3, 4096 }
 0x1bf   :  { %p1863_p7 = scmp.ne.s32.totalorder %s2052_s3, %s1862_s17  ;;  %p1866_p8 = scmp.lt.u32.totalorder %s1862_s17, %s2052_s3 }
 0x1c1   :  { %p1868_p9 = pnand %p1866_p8, %p1863_p7 }
 0x1c3   :  { %1871 = shalt.err (!%p1868_p9)
}
 0x1c4   :  { %1247 = dma.vmem_to_hbm [thread:$0]  %s1242_s13, 4096, %s2052_s3, [#allocation4], %s1882_s0, %s1882_s0, %s1883_s9  }
 0x1c5   :  { %1876 = dma.done.wait [#allocation4], 4096  }
 0x1c6   :  { %1877 = vsyncadd [#allocation4], 4294963200 }
 0x1c7   :  { %1251 = vsyncpa [#allocation3], 1 }
 0x1c8   :  { %1252 = vsyncpa [#allocation6], 1 }
 0x1c9   :  { %1253 = vsyncpa [#allocation4], 1 }

</bundles_post_ra>
